<compile_context>
chip_gen: v5e
topology: v5e:2x2
jax: 0.10.0
libtpu: 0.0.40
codegen_flags: <defaults>
</compile_context>

<pallas_src>
import jax
import jax.numpy as jnp
from jax.experimental import pallas as pl
from jax.experimental.pallas import tpu as pltpu


NC_PAD = 128  # lane-dense logits width (num_classes padded up to 128)


# ----------------------------------------------------------------------------
# Fused branch stand-in: relu(W_all^T @ x) followed by pool-to-8x8, both on the
# MXU.  Grid: (batch parallel, HW-tile reduction).
# ----------------------------------------------------------------------------
def _branches_pool_kernel(x_ref, w_ref, p_ref, o_ref):
    # x_ref: (1, Cin, hw_tile)  slice of the flattened input image
    # w_ref: (Ctot, Cin)        all four branch weights, pre-transposed
    # p_ref: (hw_tile, 64)      slice of the pooling matrix (HW -> 8x8)
    # o_ref: (1, Ctot, 64)      pooled, concatenated feature map (resident)
    t = pl.program_id(1)

    @pl.when(t == 0)
    def _():
        o_ref[...] = jnp.zeros_like(o_ref)

    y = jnp.maximum(
        jnp.dot(w_ref[...], x_ref[0], preferred_element_type=jnp.float32),
        0.0)                                                  # (Ctot, hw_tile)
    o_ref[0] += jnp.dot(y, p_ref[...],
                        preferred_element_type=jnp.float32)   # (Ctot, 64)


def _pool_to_8x8_matrix(H, W, dtype):
    # P[h*W + w, (h // (H//8)) * 8 + (w // (W//8))] = 1 / ((H//8) * (W//8))
    bh, bw = H // 8, W // 8
    idx = jnp.arange(H * W)
    h, w = idx // W, idx % W
    s = (h // bh) * 8 + (w // bw)
    return (s[:, None] == jnp.arange(64)[None, :]).astype(dtype) / (bh * bw)


def fused_branches(x_nchw, w_all, *, hw_tile=None):
    """relu(1x1-conv(x, w_all)) downsampled to an 8x8 map.

    x_nchw: (B, Cin, H, W); w_all: (Cin, Ctot)  ->  (B, Ctot, 8, 8)
    """
    B, Cin, H, W = x_nchw.shape
    Ctot = w_all.shape[1]
    HW = H * W
    assert H % 8 == 0 and W % 8 == 0, "pool-to-8x8 needs H, W divisible by 8"

    if hw_tile is None:
        # Full HW at toy shapes; cap the lane tile so double-buffered
        # input/output blocks stay well under the scoped VMEM limit at
        # production resolutions.
        hw_tile = HW if HW <= 2048 else 2048
    assert HW % hw_tile == 0
    n_hw = HW // hw_tile

    x = x_nchw.reshape(B, Cin, HW)
    w_t = w_all.T                                 # (Ctot, Cin): transpose once.
    pool = _pool_to_8x8_matrix(H, W, x.dtype)     # (HW, 64)

    out = pl.pallas_call(
        _branches_pool_kernel,
        out_shape=jax.ShapeDtypeStruct((B, Ctot, 64), jnp.float32),
        grid_spec=pl.GridSpec(
            grid=(B, n_hw),
            in_specs=[
                pl.BlockSpec((1, Cin, hw_tile), lambda b, t: (b, 0, t)),
                pl.BlockSpec((Ctot, Cin), lambda b, t: (0, 0)),
                pl.BlockSpec((hw_tile, 64), lambda b, t: (t, 0)),
            ],
            out_specs=pl.BlockSpec((1, Ctot, 64), lambda b, t: (b, 0, 0)),
        ),
        compiler_params=pltpu.CompilerParams(
            dimension_semantics=("parallel", "arbitrary")),
    )(x, w_t, pool)
    return out.reshape(B, Ctot, 8, 8)


# ----------------------------------------------------------------------------
# HP head: avg_pool2d(kernel_size=8) + dropout(eval) + flatten + Linear,
# fused into a single MXU contraction (pool folded into the FC weight).
# ----------------------------------------------------------------------------
def _hp_head_kernel(feat_ref, w_ref, b_ref, o_ref):
    # feat_ref: (B, k_tile); w_ref: (k_tile, 128); b_ref: (1, 128); o_ref: (B, 128)
    k = pl.program_id(0)

    @pl.when(k == 0)
    def _():
        o_ref[...] = jnp.zeros_like(o_ref)

    o_ref[...] += jnp.dot(feat_ref[...], w_ref[...],
                          preferred_element_type=jnp.float32)

    @pl.when(k == pl.num_programs(0) - 1)
    def _():
        o_ref[...] = o_ref[...] + b_ref[...]


def hp_head(feat_nchw, fc_w, fc_b, *, k_tile=None):
    # feat_nchw: (B, Ctot, 8, 8); fc_w: (nc, Ctot); fc_b: (nc,)
    B, C, H, W = feat_nchw.shape
    assert H == 8 and W == 8, "HP head expects an 8x8 feature map"
    nc = fc_w.shape[0]
    assert nc <= NC_PAD
    K = C * 64

    feat = feat_nchw.reshape(B, K)                      # NCHW flatten order
    # Fold the 1/64 spatial mean into the FC weight; pad lanes to 128 so the
    # logits store is lane-dense (no masked partial stores).
    w_exp = jnp.repeat(fc_w.T, 64, axis=0) / 64.0       # (K, nc)
    w_exp = jnp.pad(w_exp, ((0, 0), (0, NC_PAD - nc)))
    b_pad = jnp.pad(fc_b, (0, NC_PAD - nc)).reshape(1, NC_PAD)

    if k_tile is None:
        k_tile = K if K <= 512 else 512
    assert K % k_tile == 0
    n_k = K // k_tile

    # TODO(synk): training-mode dropout (p=0.5, scaled) not implemented;
    # F.dropout is the identity in eval mode, which is what is fused here.
    out = pl.pallas_call(
        _hp_head_kernel,
        out_shape=jax.ShapeDtypeStruct((B, NC_PAD), jnp.float32),
        grid_spec=pl.GridSpec(
            grid=(n_k,),
            in_specs=[
                pl.BlockSpec((B, k_tile), lambda k: (0, k)),
                pl.BlockSpec((k_tile, NC_PAD), lambda k: (k, 0)),
                pl.BlockSpec((1, NC_PAD), lambda k: (0, 0)),
            ],
            out_specs=pl.BlockSpec((B, NC_PAD), lambda k: (0, 0)),
        ),
        compiler_params=pltpu.CompilerParams(
            dimension_semantics=("arbitrary",)),
    )(feat, w_exp, b_pad)
    return out[:, :nc]


# ----------------------------------------------------------------------------
# Full HP forward (scaled-down branch stand-ins).
# ----------------------------------------------------------------------------
def hp_forward(x_nchw, params):
    # torch.cat((F0, F1, F2, F3), dim=1) is realized by concatenating the
    # branch weights once (tiny, in HBM) and running ONE fused branch kernel,
    # so x is read once and the concatenated 8x8 feature map is produced
    # directly (no XLA concatenate, no full-resolution writeback).
    # TODO(synk): real Inception3 / AF1 / AF2 / AF3 sub-networks are not given;
    # they are stood in by pointwise-conv+ReLU extractors with the same
    # concatenate-on-channels interface.
    w_all = jnp.concatenate(
        (params["w_mnet"], params["w_af1"], params["w_af2"], params["w_af3"]),
        axis=1)                                           # (Cin, 4*Cbranch)
    ret = fused_branches(x_nchw, w_all)                   # (B, Ctot, 8, 8)
    return hp_head(ret, params["fc_w"], params["fc_b"])


def _hp_forward_ref(x, params):
    # Pure-JAX reference for a numerical sanity check.
    def branch(w):
        y = jnp.maximum(jnp.einsum("bchw,cd->bdhw", x, w), 0.0)
        B, C, H, W = y.shape
        return y.reshape(B, C, 8, H // 8, 8, W // 8).mean(axis=(3, 5))

    ret = jnp.concatenate(
        [branch(params[k]) for k in ("w_mnet", "w_af1", "w_af2", "w_af3")],
        axis=1)
    pooled = ret.mean(axis=(2, 3))
    return pooled @ params["fc_w"].T + params["fc_b"]


def init_params(key, cin=4, c_branch=8, num_classes=26):
    ks = jax.random.split(key, 6)
    ctot = 4 * c_branch  # analog of the 2048*73 concatenated channels
    return {
        "w_mnet": 0.1 * jax.random.normal(ks[0], (cin, c_branch), jnp.float32),
        "w_af1":  0.1 * jax.random.normal(ks[1], (cin, c_branch), jnp.float32),
        "w_af2":  0.1 * jax.random.normal(ks[2], (cin, c_branch), jnp.float32),
        "w_af3":  0.1 * jax.random.normal(ks[3], (cin, c_branch), jnp.float32),
        "fc_w":   0.1 * jax.random.normal(ks[4], (num_classes, ctot), jnp.float32),
        "fc_b":   0.1 * jax.random.normal(ks[5], (num_classes,), jnp.float32),
    }


if __name__ == "__main__":
    key = jax.random.PRNGKey(0)
    k_x, k_p = jax.random.split(key)

    # Small shapes consistent with the module's forward: NCHW input with
    # spatial divisible by 8 so avg_pool2d(kernel_size=8) lands on 1x1.
    B, Cin, H, W = 2, 4, 16, 16
    num_classes = 26

    x = jax.random.normal(k_x, (B, Cin, H, W), jnp.float32)
    params = init_params(k_p, cin=Cin, c_branch=8, num_classes=num_classes)

    out = jax.jit(hp_forward)(x, params)
    out = jax.block_until_ready(out)
    assert out.shape == (B, num_classes), out.shape
    assert out.dtype == jnp.float32

    ref = jax.jit(_hp_forward_ref)(x, params)
    ref = jax.block_until_ready(ref)
    assert jnp.allclose(out, ref, atol=1e-2, rtol=1e-2), (
        float(jnp.max(jnp.abs(out - ref))))

    print("KERNEL_OK")
</pallas_src>

<mosaic_0001>
module attributes {stable_mosaic.version = 11 : i64} {
  func.func @_branches_pool_kernel(%arg0: i32, %arg1: i32, %arg2: memref<1x4x256xf32, #tpu.memory_space<vmem>>, %arg3: memref<32x4xf32, #tpu.memory_space<vmem>>, %arg4: memref<256x64xf32, #tpu.memory_space<vmem>>, %arg5: memref<1x32x64xf32, #tpu.memory_space<vmem>>) attributes {dimension_semantics = [#tpu.dimension_semantics<parallel>, #tpu.dimension_semantics<arbitrary>], iteration_bounds = array<i64: 2, 1>, scalar_prefetch = 0 : i64, scratch_operands = 0 : i64, tpu.core_type = #tpu.core_type<tc>, window_params = [{transform_indices = @transform_0, window_bounds = array<i64: 1, 4, 256>}, {pipeline_mode = #tpu.pipeline_mode<synchronous>, transform_indices = @transform_1, window_bounds = array<i64: 32, 4>}, {transform_indices = @transform_2, window_bounds = array<i64: 256, 64>}, {transform_indices = @transform_3, window_bounds = array<i64: 1, 32, 64>}]} {
    %c0_i32 = arith.constant 0 : i32
    %0 = arith.cmpi eq, %arg1, %c0_i32 : i32
    %1 = arith.extui %0 : i1 to i32
    %c0_i32_0 = arith.constant 0 : i32
    %2 = arith.cmpi ne, %1, %c0_i32_0 : i32
    scf.if %2 {
      %cst_15 = arith.constant 0.000000e+00 : f32
      %17 = vector.broadcast %cst_15 : f32 to vector<1x32x64xf32>
      %c0_16 = arith.constant 0 : index
      %c0_17 = arith.constant 0 : index
      %c0_18 = arith.constant 0 : index
      %18 = vector.load %arg5[%c0_16, %c0_17, %c0_18] : memref<1x32x64xf32, #tpu.memory_space<vmem>>, vector<1x32x64xf32>
      tpu.vector_store %arg5[%c0_16, %c0_17, %c0_18], %17 {strides = array<i32>} : memref<1x32x64xf32, #tpu.memory_space<vmem>>, vector<1x32x64xf32>,
    } else {
    }
    %c0 = arith.constant 0 : index
    %c0_1 = arith.constant 0 : index
    %3 = vector.load %arg3[%c0, %c0_1] : memref<32x4xf32, #tpu.memory_space<vmem>>, vector<32x4xf32>
    %c0_2 = arith.constant 0 : index
    %c0_3 = arith.constant 0 : index
    %c0_4 = arith.constant 0 : index
    %4 = vector.load %arg2[%c0_2, %c0_3, %c0_4] : memref<1x4x256xf32, #tpu.memory_space<vmem>>, vector<1x4x256xf32>
    %5 = vector.shape_cast %4 : vector<1x4x256xf32> to vector<4x256xf32>
    %cst = arith.constant dense<0.000000e+00> : vector<32x256xf32>
    %6 = tpu.matmul %3, %5, %cst {dimension_numbers = #tpu.dot_dimension_numbers<[1], [0], [0], [1], [0, 0, 1, 1], [], []>} : vector<32x4xf32>, vector<4x256xf32>, vector<32x256xf32> -> vector<32x256xf32>
    %cst_5 = arith.constant 0.000000e+00 : f32
    %7 = vector.broadcast %cst_5 : f32 to vector<32x256xf32>
    %8 = arith.maximumf %6, %7 : vector<32x256xf32>
    %c0_6 = arith.constant 0 : index
    %c0_7 = arith.constant 0 : index
    %c0_8 = arith.constant 0 : index
    %9 = vector.load %arg5[%c0_6, %c0_7, %c0_8] : memref<1x32x64xf32, #tpu.memory_space<vmem>>, vector<1x32x64xf32>
    %10 = vector.shape_cast %9 : vector<1x32x64xf32> to vector<32x64xf32>
    %c0_9 = arith.constant 0 : index
    %c0_10 = arith.constant 0 : index
    %11 = vector.load %arg4[%c0_9, %c0_10] : memref<256x64xf32, #tpu.memory_space<vmem>>, vector<256x64xf32>
    %cst_11 = arith.constant dense<0.000000e+00> : vector<32x64xf32>
    %12 = tpu.matmul %8, %11, %cst_11 {dimension_numbers = #tpu.dot_dimension_numbers<[1], [0], [0], [1], [0, 0, 1, 1], [], []>} : vector<32x256xf32>, vector<256x64xf32>, vector<32x64xf32> -> vector<32x64xf32>
    %13 = arith.addf %10, %12 : vector<32x64xf32>
    %c0_12 = arith.constant 0 : index
    %c0_13 = arith.constant 0 : index
    %c0_14 = arith.constant 0 : index
    %14 = vector.load %arg5[%c0_12, %c0_13, %c0_14] : memref<1x32x64xf32, #tpu.memory_space<vmem>>, vector<1x32x64xf32>
    %15 = vector.shape_cast %14 : vector<1x32x64xf32> to vector<32x64xf32>
    %16 = vector.shape_cast %13 : vector<32x64xf32> to vector<1x32x64xf32>
    tpu.vector_store %arg5[%c0_12, %c0_13, %c0_14], %16 {strides = array<i32>} : memref<1x32x64xf32, #tpu.memory_space<vmem>>, vector<1x32x64xf32>,
    return
  }
  func.func @transform_0(%arg0: i32, %arg1: i32) -> (i32, i32, i32) {
    %c0_i32 = arith.constant 0 : i32
    %c0_i32_0 = arith.constant 0 : i32
    return %arg0, %c0_i32, %arg1 : i32, i32, i32
  }
  func.func @transform_1(%arg0: i32, %arg1: i32) -> (i32, i32) {
    %c0_i32 = arith.constant 0 : i32
    %c0_i32_0 = arith.constant 0 : i32
    %c0_i32_1 = arith.constant 0 : i32
    return %c0_i32, %c0_i32_0 : i32, i32
  }
  func.func @transform_2(%arg0: i32, %arg1: i32) -> (i32, i32) {
    %c0_i32 = arith.constant 0 : i32
    %c0_i32_0 = arith.constant 0 : i32
    return %arg1, %c0_i32 : i32, i32
  }
  func.func @transform_3(%arg0: i32, %arg1: i32) -> (i32, i32, i32) {
    %c0_i32 = arith.constant 0 : i32
    %c0_i32_0 = arith.constant 0 : i32
    %c0_i32_1 = arith.constant 0 : i32
    return %arg0, %c0_i32, %c0_i32_0 : i32, i32, i32
  }
}

module attributes {stable_mosaic.version = 11 : i64} {
  func.func @_hp_head_kernel(%arg0: i32, %arg1: memref<2x512xf32, #tpu.memory_space<vmem>>, %arg2: memref<512x128xf32, #tpu.memory_space<vmem>>, %arg3: memref<1x128xf32, #tpu.memory_space<vmem>>, %arg4: memref<2x128xf32, #tpu.memory_space<vmem>>) attributes {dimension_semantics = [#tpu.dimension_semantics<arbitrary>], iteration_bounds = array<i64: 4>, scalar_prefetch = 0 : i64, scratch_operands = 0 : i64, tpu.core_type = #tpu.core_type<tc>, window_params = [{transform_indices = @transform_0, window_bounds = array<i64: 2, 512>}, {transform_indices = @transform_1, window_bounds = array<i64: 512, 128>}, {pipeline_mode = #tpu.pipeline_mode<synchronous>, transform_indices = @transform_2, window_bounds = array<i64: 1, 128>}, {pipeline_mode = #tpu.pipeline_mode<synchronous>, transform_indices = @transform_3, window_bounds = array<i64: 2, 128>}]} {
    %c0_i32 = arith.constant 0 : i32
    %0 = arith.cmpi eq, %arg0, %c0_i32 : i32
    %1 = arith.extui %0 : i1 to i32
    %c0_i32_0 = arith.constant 0 : i32
    %2 = arith.cmpi ne, %1, %c0_i32_0 : i32
    scf.if %2 {
      %cst_9 = arith.constant 0.000000e+00 : f32
      %12 = vector.broadcast %cst_9 : f32 to vector<2x128xf32>
      %c0_10 = arith.constant 0 : index
      %c0_11 = arith.constant 0 : index
      %13 = vector.load %arg4[%c0_10, %c0_11] : memref<2x128xf32, #tpu.memory_space<vmem>>, vector<2x128xf32>
      tpu.vector_store %arg4[%c0_10, %c0_11], %12 {strides = array<i32>} : memref<2x128xf32, #tpu.memory_space<vmem>>, vector<2x128xf32>,
    } else {
    }
    %c0 = arith.constant 0 : index
    %c0_1 = arith.constant 0 : index
    %3 = vector.load %arg4[%c0, %c0_1] : memref<2x128xf32, #tpu.memory_space<vmem>>, vector<2x128xf32>
    %c0_2 = arith.constant 0 : index
    %c0_3 = arith.constant 0 : index
    %4 = vector.load %arg1[%c0_2, %c0_3] : memref<2x512xf32, #tpu.memory_space<vmem>>, vector<2x512xf32>
    %c0_4 = arith.constant 0 : index
    %c0_5 = arith.constant 0 : index
    %5 = vector.load %arg2[%c0_4, %c0_5] : memref<512x128xf32, #tpu.memory_space<vmem>>, vector<512x128xf32>
    %cst = arith.constant dense<0.000000e+00> : vector<2x128xf32>
    %6 = tpu.matmul %4, %5, %cst {dimension_numbers = #tpu.dot_dimension_numbers<[1], [0], [0], [1], [0, 0, 1, 1], [], []>} : vector<2x512xf32>, vector<512x128xf32>, vector<2x128xf32> -> vector<2x128xf32>
    %7 = arith.addf %3, %6 : vector<2x128xf32>
    %c0_6 = arith.constant 0 : index
    %c0_7 = arith.constant 0 : index
    %8 = vector.load %arg4[%c0_6, %c0_7] : memref<2x128xf32, #tpu.memory_space<vmem>>, vector<2x128xf32>
    tpu.vector_store %arg4[%c0_6, %c0_7], %7 {strides = array<i32>} : memref<2x128xf32, #tpu.memory_space<vmem>>, vector<2x128xf32>,
    %c3_i32 = arith.constant 3 : i32
    %9 = arith.cmpi eq, %arg0, %c3_i32 : i32
    %10 = arith.extui %9 : i1 to i32
    %c0_i32_8 = arith.constant 0 : i32
    %11 = arith.cmpi ne, %10, %c0_i32_8 : i32
    scf.if %11 {
      %c0_9 = arith.constant 0 : index
      %c0_10 = arith.constant 0 : index
      %12 = vector.load %arg4[%c0_9, %c0_10] : memref<2x128xf32, #tpu.memory_space<vmem>>, vector<2x128xf32>
      %c0_11 = arith.constant 0 : index
      %c0_12 = arith.constant 0 : index
      %13 = vector.load %arg3[%c0_11, %c0_12] : memref<1x128xf32, #tpu.memory_space<vmem>>, vector<1x128xf32>
      %14 = vector.broadcast %13 : vector<1x128xf32> to vector<2x128xf32>
      %15 = arith.addf %12, %14 : vector<2x128xf32>
      %c0_13 = arith.constant 0 : index
      %c0_14 = arith.constant 0 : index
      %16 = vector.load %arg4[%c0_13, %c0_14] : memref<2x128xf32, #tpu.memory_space<vmem>>, vector<2x128xf32>
      tpu.vector_store %arg4[%c0_13, %c0_14], %15 {strides = array<i32>} : memref<2x128xf32, #tpu.memory_space<vmem>>, vector<2x128xf32>,
    } else {
    }
    return
  }
  func.func @transform_0(%arg0: i32) -> (i32, i32) {
    %c0_i32 = arith.constant 0 : i32
    %c0_i32_0 = arith.constant 0 : i32
    return %c0_i32, %arg0 : i32, i32
  }
  func.func @transform_1(%arg0: i32) -> (i32, i32) {
    %c0_i32 = arith.constant 0 : i32
    %c0_i32_0 = arith.constant 0 : i32
    return %arg0, %c0_i32 : i32, i32
  }
  func.func @transform_2(%arg0: i32) -> (i32, i32) {
    %c0_i32 = arith.constant 0 : i32
    %c0_i32_0 = arith.constant 0 : i32
    %c0_i32_1 = arith.constant 0 : i32
    return %c0_i32, %c0_i32_0 : i32, i32
  }
  func.func @transform_3(%arg0: i32) -> (i32, i32) {
    %c0_i32 = arith.constant 0 : i32
    %c0_i32_0 = arith.constant 0 : i32
    %c0_i32_1 = arith.constant 0 : i32
    return %c0_i32, %c0_i32_0 : i32, i32
  }
}

</mosaic_0001>

<bundles_post_ra>
// kernel: hp_forward.3
= control target key start
LH: loop header
LB: loop body
LE: loop exit
PB: predicated region body
PF: predicated region fallthrough
CT: control target
= control target key end

     0   :  { %8 = vsyncpa [#allocation3], 0  ;;  %s508_s12 = smov 0   ;;  %s607_s0 = inlined_call_operand.vmem [shape: f32[2,2048], index: 0, kind: input, shape index: {}]   ;;  %s608_s1 = inlined_call_operand.vmem [shape: f32[2048,128], index: 1, kind: input, shape index: {}]   ;;  %s609_s2 = inlined_call_operand.vmem [shape: f32[1,128], index: 2, kind: input, shape index: {}]   ;;  %s610_s3 = inlined_call_operand.hbm [shape: f32[2,128], index: 3, kind: output, shape index: {}]  }
   0x1 LB: > { %s514_s13 = sadd.s32 4294967295, %s484_s12   ;;  %p418_p0 = scmp.ge.s32.totalorder %s484_s12, 1  ;;  %s484_s12 = sphi %s508_s12, %s14_s12  }
   0x2   : > { %p145_p1 = scmp.lt.s32.totalorder %s484_s12, 5 }
   0x4   : > { %p146_p2 = pnand %p418_p0, %p145_p1 }
   0x5   : > { %s419_s14 = sshll.u32 (!%p146_p2), %s514_s13, 2  ;;  %s421_s15 = sshll.u32 (!%p146_p2), %s514_s13, 6 }
   0x6   : > { %149 = sbr.rel (%p146_p2) target bundleno = 208 (0xd0), region = 32  ;;  %p170_p3 = scmp.lt.s32.totalorder (!%p146_p2), %s419_s14, 15 }
   0x7   : > { %p176_p4 = scmp.lt.s32.totalorder (!%p146_p2), %s421_s15, 255  ;;  %p423_p5 = scmp.ne.s32.totalorder (!%p146_p2), %s514_s13, 0 }
   0xb   : > { %s612_s14 = smov (!%p170_p3, %s419_s14), 15  ;;  %s614_s15 = smov (!%p176_p4, %s421_s15), 255 }
   0xc   : > { %s420_s16 = sshll.u32 %s612_s14, 1  ;;  %s422_s20 = sshll.u32 %s614_s15, 3 }
   0xd   : > { %s523_s19 = scalar_lea.vmem %s607_s0, %s420_s16  ;;  %s528_s23 = scalar_lea.vmem %s608_s1, %s422_s20 }
   0xe   : > { %184 = sbr.rel (%p423_p5) target bundleno = 21 (0x15), region = 36 }
  0x13   : > { %v486_v0 = vmov 0.0  }
  0x14   : > { %185 = vst [vmem:[#allocation2] sm:$0x3] %v486_v0 }
  0x15 PF: > { %v235_v1 = vld [vmem:[%s528_s23 + $0x178] sm:$0xff]  ;;  %v234_v2 = vld [vmem:[%s528_s23 + $0x170] sm:$0xff]  ;;  %v233_v6 = vld [vmem:[%s528_s23 + $0x168] sm:$0xff]  ;;  %p424_p6 = scmp.ne.s32.totalorder %s514_s13, 3 }
  0x16   : > { %v251_v3 = vld [vmem:[%s528_s23 + $0x1f8] sm:$0xff]  ;;  %302 = vmatpush.msra.mxu2 %v235_v1  ;;  %v250_v7 = vld [vmem:[%s528_s23 + $0x1f0] sm:$0xff]  ;;  %v249_v10 = vld [vmem:[%s528_s23 + $0x1e8] sm:$0xff] }
  0x17   : > { %322 = vmatpush.msra.mxu3 %v251_v3  ;;  %v203_v4 = vld [vmem:[%s528_s23 + $0x78] sm:$0xff]  ;;  %v202_v8 = vld [vmem:[%s528_s23 + $0x70] sm:$0xff]  ;;  %v201_v11 = vld [vmem:[%s528_s23 + $0x68] sm:$0xff] }
  0x18   : > { %v219_v5 = vld [vmem:[%s528_s23 + $0xf8] sm:$0xff]  ;;  %262 = vmatpush.msra.mxu0 %v203_v4  ;;  %v218_v9 = vld [vmem:[%s528_s23 + $0xf0] sm:$0xff]  ;;  %303 = vmatpush.msra.mxu2 %v234_v2  ;;  %v232_v12 = vld [vmem:[%s528_s23 + $0x160] sm:$0xff] }
  0x19   : > { %282 = vmatpush.msra.mxu1 %v219_v5  ;;  %323 = vmatpush.msra.mxu3 %v250_v7  ;;  %v217_v13 = vld [vmem:[%s528_s23 + $0xe8] sm:$0xff]  ;;  %v248_v14 = vld [vmem:[%s528_s23 + $0x1e0] sm:$0xff]  ;;  %v231_v17 = vld [vmem:[%s528_s23 + $0x158] sm:$0xff] }
  0x1a   : > { %263 = vmatpush.msra.mxu0 %v202_v8  ;;  %304 = vmatpush.msra.mxu2 %v233_v6  ;;  %v200_v15 = vld [vmem:[%s528_s23 + $0x60] sm:$0xff]  ;;  %v247_v18 = vld [vmem:[%s528_s23 + $0x1d8] sm:$0xff]  ;;  %v230_v21 = vld [vmem:[%s528_s23 + $0x150] sm:$0xff] }
  0x1b   : > { %283 = vmatpush.msra.mxu1 %v218_v9  ;;  %324 = vmatpush.msra.mxu3 %v249_v10  ;;  %v216_v16 = vld [vmem:[%s528_s23 + $0xe0] sm:$0xff]  ;;  %v199_v19 = vld [vmem:[%s528_s23 + $0x58] sm:$0xff]  ;;  %v246_v22 = vld [vmem:[%s528_s23 + $0x1d0] sm:$0xff] }
  0x1c   : > { %264 = vmatpush.msra.mxu0 %v201_v11  ;;  %305 = vmatpush.msra.mxu2 %v232_v12  ;;  %v215_v20 = vld [vmem:[%s528_s23 + $0xd8] sm:$0xff]  ;;  %v198_v23 = vld [vmem:[%s528_s23 + $0x50] sm:$0xff]  ;;  %v229_v25 = vld [vmem:[%s528_s23 + $0x148] sm:$0xff] }
  0x1d   : > { %284 = vmatpush.msra.mxu1 %v217_v13  ;;  %325 = vmatpush.msra.mxu3 %v248_v14  ;;  %v214_v24 = vld [vmem:[%s528_s23 + $0xd0] sm:$0xff]  ;;  %v245_v26 = vld [vmem:[%s528_s23 + $0x1c8] sm:$0xff]  ;;  %v228_v29 = vld [vmem:[%s528_s23 + $0x140] sm:$0xff] }
  0x1e   : > { %265 = vmatpush.msra.mxu0 %v200_v15  ;;  %306 = vmatpush.msra.mxu2 %v231_v17  ;;  %v197_v27 = vld [vmem:[%s528_s23 + $0x48] sm:$0xff]  ;;  %v244_v30 = vld [vmem:[%s528_s23 + $0x1c0] sm:$0xff]  ;;  %v227_v33 = vld [vmem:[%s528_s23 + $0x138] sm:$0xff] }
  0x1f   : > { %285 = vmatpush.msra.mxu1 %v216_v16  ;;  %326 = vmatpush.msra.mxu3 %v247_v18  ;;  %v213_v28 = vld [vmem:[%s528_s23 + $0xc8] sm:$0xff]  ;;  %v196_v31 = vld [vmem:[%s528_s23 + $0x40] sm:$0xff]  ;;  %v243_v34 = vld [vmem:[%s528_s23 + $0x1b8] sm:$0xff] }
  0x20   : > { %266 = vmatpush.msra.mxu0 %v199_v19  ;;  %307 = vmatpush.msra.mxu2 %v230_v21  ;;  %v212_v32 = vld [vmem:[%s528_s23 + $0xc0] sm:$0xff]  ;;  %v195_v35 = vld [vmem:[%s528_s23 + $0x38] sm:$0xff]  ;;  %v226_v37 = vld [vmem:[%s528_s23 + $0x130] sm:$0xff] }
  0x21   : > { %286 = vmatpush.msra.mxu1 %v215_v20  ;;  %327 = vmatpush.msra.mxu3 %v246_v22  ;;  %v211_v36 = vld [vmem:[%s528_s23 + $0xb8] sm:$0xff]  ;;  %v242_v38 = vld [vmem:[%s528_s23 + $0x1b0] sm:$0xff]  ;;  %v225_v41 = vld [vmem:[%s528_s23 + $0x128] sm:$0xff] }
  0x22   : > { %267 = vmatpush.msra.mxu0 %v198_v23  ;;  %308 = vmatpush.msra.mxu2 %v229_v25  ;;  %v194_v39 = vld [vmem:[%s528_s23 + $0x30] sm:$0xff]  ;;  %v241_v42 = vld [vmem:[%s528_s23 + $0x1a8] sm:$0xff]  ;;  %v187_v45 = vld [vmem:[%s523_s19] sm:$0xff] }
  0x23   : > { %287 = vmatpush.msra.mxu1 %v214_v24  ;;  %328 = vmatpush.msra.mxu3 %v245_v26  ;;  %v210_v40 = vld [vmem:[%s528_s23 + $0xb0] sm:$0xff]  ;;  %v193_v43 = vld [vmem:[%s528_s23 + $0x28] sm:$0xff]  ;;  %v224_v46 = vld [vmem:[%s528_s23 + $0x120] sm:$0xff]  ;;  %253 = vst [vmem:[#allocation1] ss:$4 sm:$0xff] %v187_v45 }
  0x24   : > { %268 = vmatpush.msra.mxu0 %v197_v27  ;;  %309 = vmatpush.msra.mxu2 %v228_v29  ;;  %v209_v44 = vld [vmem:[%s528_s23 + $0xa8] sm:$0xff]  ;;  %v240_v47 = vld [vmem:[%s528_s23 + $0x1a0] sm:$0xff]  ;;  %v223_v50 = vld [vmem:[%s528_s23 + $0x118] sm:$0xff] }
  0x25   : > { %288 = vmatpush.msra.mxu1 %v213_v28  ;;  %329 = vmatpush.msra.mxu3 %v244_v30  ;;  %v192_v48 = vld [vmem:[%s528_s23 + $0x20] sm:$0xff]  ;;  %v239_v51 = vld [vmem:[%s528_s23 + $0x198] sm:$0xff]  ;;  %v222_v54 = vld [vmem:[%s528_s23 + $0x110] sm:$0xff] }
  0x26   : > { %269 = vmatpush.msra.mxu0 %v196_v31  ;;  %310 = vmatpush.msra.mxu2 %v227_v33  ;;  %v208_v49 = vld [vmem:[%s528_s23 + $0xa0] sm:$0xff]  ;;  %v191_v52 = vld [vmem:[%s528_s23 + $0x18] sm:$0xff]  ;;  %v238_v55 = vld [vmem:[%s528_s23 + $0x190] sm:$0xff] }
  0x27   : > { %289 = vmatpush.msra.mxu1 %v212_v32  ;;  %330 = vmatpush.msra.mxu3 %v243_v34  ;;  %v207_v53 = vld [vmem:[%s528_s23 + $0x98] sm:$0xff]  ;;  %v190_v56 = vld [vmem:[%s528_s23 + $0x10] sm:$0xff]  ;;  %v221_v58 = vld [vmem:[%s528_s23 + $0x108] sm:$0xff] }
  0x28   : > { %270 = vmatpush.msra.mxu0 %v195_v35  ;;  %311 = vmatpush.msra.mxu2 %v226_v37  ;;  %v206_v57 = vld [vmem:[%s528_s23 + $0x90] sm:$0xff]  ;;  %v237_v59 = vld [vmem:[%s528_s23 + $0x188] sm:$0xff]  ;;  %v220_v62 = vld [vmem:[%s528_s23 + $0x100] sm:$0xff] }
  0x29   : > { %290 = vmatpush.msra.mxu1 %v211_v36  ;;  %331 = vmatpush.msra.mxu3 %v242_v38  ;;  %v189_v60 = vld [vmem:[%s528_s23 + $0x8] sm:$0xff]  ;;  %v236_v63 = vld [vmem:[%s528_s23 + $0x180] sm:$0xff] }
  0x2a   : > { %271 = vmatpush.msra.mxu0 %v194_v39  ;;  %312 = vmatpush.msra.mxu2 %v225_v41  ;;  %v205_v61 = vld [vmem:[%s528_s23 + $0x88] sm:$0xff]  ;;  %v256_v0 = vld.sshfl [vmem:[#allocation1 + $0x10] sm:$0xff pattern:$0x73625140]  ;;  %v188_v2 = vld [vmem:[%s528_s23] sm:$0xff] }
  0x2b   : > { %291 = vmatpush.msra.mxu1 %v210_v40  ;;  %332 = vmatpush.msra.mxu3 %v241_v42  ;;  %v257_v1 = vld.sshfl [vmem:[#allocation1 + $0x18] sm:$0xff pattern:$0x73625140]  ;;  %v204_v3 = vld [vmem:[%s528_s23 + $0x80] sm:$0xff]  ;;  %v186_v12 = vld [vmem:[#allocation2] sm:$0x3] }
  0x2c   : > { %272 = vmatpush.msra.mxu0 %v193_v43  ;;  %313 = vmatpush.msra.mxu2 %v224_v46  ;;  %v254_v4 = vld.sshfl [vmem:[#allocation1] sm:$0xff pattern:$0x73625140]  ;;  %v255_v5 = vld.sshfl [vmem:[#allocation1 + $0x8] sm:$0xff pattern:$0x73625140] }
  0x2d   : > { %292 = vmatpush.msra.mxu1 %v209_v44  ;;  %333 = vmatpush.msra.mxu3 %v240_v47 }
  0x2e   : > { %273 = vmatpush.msra.mxu0 %v192_v48  ;;  %314 = vmatpush.msra.mxu2 %v223_v50 }
  0x2f   : > { %293 = vmatpush.msra.mxu1 %v208_v49  ;;  %334 = vmatpush.msra.mxu3 %v239_v51 }
  0x30   : > { %274 = vmatpush.msra.mxu0 %v191_v52  ;;  %315 = vmatpush.msra.mxu2 %v222_v54 }
  0x31   : > { %294 = vmatpush.msra.mxu1 %v207_v53  ;;  %335 = vmatpush.msra.mxu3 %v238_v55 }
  0x32   : > { %275 = vmatpush.msra.mxu0 %v190_v56  ;;  %316 = vmatpush.msra.mxu2 %v221_v58 }
  0x33   : > { %295 = vmatpush.msra.mxu1 %v206_v57  ;;  %336 = vmatpush.msra.mxu3 %v237_v59 }
  0x34   : > { %276 = vmatpush.msra.mxu0 %v189_v60  ;;  %317 = vmatpush.msra.mxu2 %v220_v62 }
  0x35   : > { %296 = vmatpush.msra.mxu1 %v205_v61  ;;  %337 = vmatpush.msra.mxu3 %v236_v63 }
  0x36   : > { %318 = vmatmul.f32.vlgmr.msra.gmra.mxu2 %v256_v0  ;;  %338 = vmatmul.f32.vlgmr.msra.gmra.mxu3 %v257_v1 }
  0x37   : > { %277 = vmatpush.msra.mxu0 %v188_v2  ;;  %297 = vmatpush.msra.mxu1 %v204_v3 }
  0x38   : > { %278 = vmatmul.f32.vlgmr.msra.gmra.mxu0 %v254_v4  ;;  %298 = vmatmul.f32.vlgmr.msra.gmra.mxu1 %v255_v5 }
  0xb5   : > { %v279_v6 = vpop.f32.mrf.mxu0  ;;  %v299_v7 = vpop.f32.mrf.mxu1 }
  0xb6   : > { %v300_v8 = vadd.f32 %v299_v7, %v279_v6 }
  0xb9   : > { %v319_v9 = vpop.f32.mrf.mxu2  ;;  %v339_v10 = vpop.f32.mrf.mxu3 }
  0xba   : > { %v320_v11 = vadd.f32 %v319_v9, %v300_v8 }
  0xbc   : > { %v340_v13 = vadd.f32 %v339_v10, %v320_v11  ;;  %347 = sbr.rel (%p424_p6) target bundleno = 203 (0xcb), region = 40 }
  0xbe   : > { %v342_v14 = vadd.f32 %v340_v13, %v186_v12 }
  0xc0   : > { %343 = vst [vmem:[#allocation2] sm:$0x3] %v342_v14 }
  0xc1   : > { %v445_v16 = vld [vmem:[%s609_s2] ss:$0 sm:$0xff] }
  0xc7   : > { %v348_v15 = vld [vmem:[#allocation2] sm:$0x3] }
  0xc8   : > { %v353_v17 = vadd.f32 %v445_v16, %v348_v15 }
  0xca   : > { %354 = vst [vmem:[#allocation2] sm:$0x3] %v353_v17 }
  0xcb PF: > { %p433_p7 = scmp.eq.s32.totalorder %s514_s13, 3  ;;  %s487_s26 = smov [#allocation2]  }
  0xcc   : > { %s361_s27 = sshll.u32 %s487_s26, 4  ;;  %s363_s30 = sshll.u32 %s610_s3, 4  ;;  %s362_s27 = int_to_ptr.vmem [resolvable:$true] %s361_s27  ;;  %s364_s30 = int_to_ptr.hbm [resolvable:$true] %s363_s30 }
  0xcd   : > { %430 = dma.vmem_to_hbm [thread:$0]  (%p433_p7), %s362_s27, 32, %s364_s30, [#allocation3]  }
  0xce   : > { %479 = dma.done.wait (%p433_p7), [#allocation3], 32  }
  0xcf   : > { %481 = vsyncadd (%p433_p7), [#allocation3], 4294967264 }
  0xd0 PF: > { %s14_s12 = sadd.s32 1, %s484_s12  }
  0xd1   : > { %p11_p8 = scmp.ge.s32.totalorder %s14_s12, 6  }
  0xd3   :  { %13 = sbr.rel (!%p11_p8) target bundleno = 1 (0x1), region = 70 }
  0xd8   :  { %377 = vsyncpa [#allocation3], 1 }
  0xd9   :  { %379 = vsyncpa [#allocation3 + $0x1], 1 }

// kernel: hp_forward.2
= control target key start
LH: loop header
LB: loop body
LE: loop exit
PB: predicated region body
PF: predicated region fallthrough
CT: control target
= control target key end

     0   :  { %s637_s12 = smov 0   ;;  %s639_s13 = smov 0   ;;  %s798_s0 = inlined_call_operand.vmem [shape: f32[2,4,256], index: 0, kind: input, shape index: {}]   ;;  %s799_s1 = inlined_call_operand.vmem [shape: f32[32,4], index: 1, kind: input, shape index: {}]   ;;  %s800_s2 = inlined_call_operand.vmem [shape: f32[256,64], index: 2, kind: input, shape index: {}]   ;;  %s801_s3 = inlined_call_operand.vmem [shape: f32[2,32,64], index: 3, kind: output, shape index: {}]  }
   0x1   :  { %s641_s14 = smov 0  }
   0x2 LB: > { %s25_s15 = sadd.s32 1, %s610_s13  ;;  %p516_p0 = scmp.ge.s32.totalorder %s614_s14, 1  ;;  %s614_s14 = sphi %s641_s14, %s13_s14   ;;  %s610_s13 = sphi %s639_s13, %s803_s13   ;;  %s606_s12 = sphi %s637_s12, %s802_s12  }
   0x3   : > { %p27_p1 = scmp.ge.s32.totalorder %s25_s15, 2  ;;  %p167_p2 = scmp.lt.s32.totalorder %s614_s14, 3 }
   0x5   : > { %s805_s15 = smov (%p27_p1, %s25_s15), 0  ;;  %p168_p3 = pnand %p516_p0, %p167_p2 }
   0x6   : > { %p201_p4 = scmp.lt.s32.totalorder (!%p168_p3), %s606_s12, 1 }
   0x7   : > { %171 = sbr.rel (%p168_p3) target bundleno = 314 (0x13a), region = 32 }
   0xc   : > { %s807_s12 = smov (!%p201_p4, %s606_s12), 1  ;;  %v342_v1 = vld [vmem:[%s800_s2 + $0x78] sm:$0xff]  ;;  %v341_v3 = vld [vmem:[%s800_s2 + $0x70] sm:$0xff]  ;;  %vm252_vm0 = vcmask 1043456   ;;  %v340_v5 = vld [vmem:[%s800_s2 + $0x68] sm:$0xff]  ;;  %vm239_vm1 = vcmask 31744  }
   0xd   : > { %s533_s16 = sshll.u32 %s807_s12, 3  ;;  %v358_v2 = vld [vmem:[%s800_s2 + $0xf8] sm:$0xff]  ;;  %535 = vmatpush.msra.mxu2 %v342_v1  ;;  %v357_v4 = vld [vmem:[%s800_s2 + $0xf0] sm:$0xff]  ;;  %v356_v6 = vld [vmem:[%s800_s2 + $0xe8] sm:$0xff]  ;;  %s534_s23 = sshll.u32 %s807_s12, 5  ;;  %vm225_vm2 = vcmask 523264  }
   0xe   : > { %s208_s19 = scalar_lea.vmem %s798_s0, %s533_s16  ;;  %551 = vmatpush.msra.mxu3 %v358_v2  ;;  %v230_v7 = vld [vmem:[%s799_s1] sm:$0xff]  ;;  %v338_v12 = vld [vmem:[%s800_s2 + $0x58] sm:$0xff]  ;;  %v231_v14 = vld [vmem:[%s799_s1 + $0x8] sm:$0xff]  ;;  %s220_s26 = scalar_lea.vmem %s801_s3, %s534_s23  ;;  %v616_v55 = vmov 0.0  }
   0xf   : > { %v234_v0 = vld [vmem:[%s208_s19] sm:$0xff]  ;;  %536 = vmatpush.msra.mxu2 %v341_v3  ;;  %v354_v13 = vld [vmem:[%s800_s2 + $0xd8] sm:$0xff]  ;;  %v337_v15 = vld [vmem:[%s800_s2 + $0x50] sm:$0xff]  ;;  %226 = vst.msk [vmem:[%s220_s26] sm:$0xff] %vm225_vm2, %v616_v55 }
  0x10   : > { %236 = vst [vmem:[#allocation1] ss:$2 sm:$0xff] %v234_v0  ;;  %552 = vmatpush.msra.mxu3 %v357_v4  ;;  %v339_v10 = vld [vmem:[%s800_s2 + $0x60] sm:$0xff]  ;;  %v353_v16 = vld [vmem:[%s800_s2 + $0xd0] sm:$0xff]  ;;  %v336_v17 = vld [vmem:[%s800_s2 + $0x48] sm:$0xff] }
  0x11   : > { %537 = vmatpush.msra.mxu2 %v340_v5  ;;  %v355_v11 = vld [vmem:[%s800_s2 + $0xe0] sm:$0xff]  ;;  %v352_v18 = vld [vmem:[%s800_s2 + $0xc8] sm:$0xff]  ;;  %v232_v21 = vld [vmem:[%s799_s1 + $0x10] sm:$0xff]  ;;  %227 = vst.msk [vmem:[%s220_s26 + $0x8] sm:$0xff] %vm225_vm2, %v616_v55 }
  0x12   : > { %553 = vmatpush.msra.mxu3 %v356_v6  ;;  %v335_v19 = vld [vmem:[%s800_s2 + $0x40] sm:$0xff]  ;;  %v334_v22 = vld [vmem:[%s800_s2 + $0x38] sm:$0xff]  ;;  %v333_v24 = vld [vmem:[%s800_s2 + $0x30] sm:$0xff]  ;;  %228 = vst.msk [vmem:[%s220_s26 + $0x10] sm:$0xff] %vm225_vm2, %v616_v55 }
  0x13   : > { %538 = vmatpush.msra.mxu2 %v339_v10  ;;  %v351_v20 = vld [vmem:[%s800_s2 + $0xc0] sm:$0xff]  ;;  %v350_v23 = vld [vmem:[%s800_s2 + $0xb8] sm:$0xff]  ;;  %v349_v25 = vld [vmem:[%s800_s2 + $0xb0] sm:$0xff]  ;;  %229 = vst.msk [vmem:[%s220_s26 + $0x18] sm:$0xff] %vm225_vm2, %v616_v55 }
  0x14   : > { %554 = vmatpush.msra.mxu3 %v355_v11  ;;  %v332_v26 = vld [vmem:[%s800_s2 + $0x28] sm:$0xff]  ;;  %v331_v28 = vld [vmem:[%s800_s2 + $0x20] sm:$0xff]  ;;  %v233_v30 = vld [vmem:[%s799_s1 + $0x18] sm:$0xff] }
  0x15   : > { %539 = vmatpush.msra.mxu2 %v338_v12  ;;  %v348_v27 = vld [vmem:[%s800_s2 + $0xa8] sm:$0xff]  ;;  %v347_v29 = vld [vmem:[%s800_s2 + $0xa0] sm:$0xff]  ;;  %v330_v31 = vld [vmem:[%s800_s2 + $0x18] sm:$0xff] }
  0x16   : > { %555 = vmatpush.msra.mxu3 %v354_v13  ;;  %v346_v32 = vld [vmem:[%s800_s2 + $0x98] sm:$0xff]  ;;  %v329_v33 = vld [vmem:[%s800_s2 + $0x10] sm:$0xff]  ;;  %v328_v35 = vld [vmem:[%s800_s2 + $0x8] sm:$0xff] }
  0x17   : > { %v237_v8 = vld.sshfl [vmem:[#allocation1] sm:$0xff pattern:$0x75316420]  ;;  %v238_v9 = vld.sshfl [vmem:[#allocation1 + $0x8] sm:$0xff pattern:$0x75316420]  ;;  %540 = vmatpush.msra.mxu2 %v337_v15 }
  0x18   : > { %521 = vmatpush.msk.msra.mxu0 %vm252_vm0, %v237_v8  ;;  %526 = vmatpush.msk.msra.mxu1 %vm252_vm0, %v238_v9  ;;  %v345_v34 = vld [vmem:[%s800_s2 + $0x90] sm:$0xff]  ;;  %v344_v36 = vld [vmem:[%s800_s2 + $0x88] sm:$0xff]  ;;  %v327_v37 = vld [vmem:[%s800_s2] sm:$0xff] }
  0x19   : > { %522 = vmatmul.msk.f32.vlgmr.msra.gmra.mxu0 %vm239_vm1, %v230_v7  ;;  %527 = vmatmul.msk.f32.vlgmr.msra.gmra.mxu1 %vm239_vm1, %v230_v7  ;;  %v343_v38 = vld [vmem:[%s800_s2 + $0x80] sm:$0xff]  ;;  %v324_v62 = vld [vmem:[%s220_s26 + $0x8] sm:$0xff] }
  0x1a   : > { %359 = vmatpush.msrb.mxu0 %v342_v1  ;;  %388 = vmatpush.msrb.mxu1 %v358_v2  ;;  %v323_v57 = vld [vmem:[%s220_s26] sm:$0xff]  ;;  %v326_v8 = vld [vmem:[%s220_s26 + $0x18] sm:$0xff] }
  0x1b   : > { %556 = vmatpush.msra.mxu3 %v353_v16  ;;  %541 = vmatpush.msra.mxu2 %v336_v17 }
  0x1c   : > { %360 = vmatpush.msrb.mxu0 %v341_v3  ;;  %389 = vmatpush.msrb.mxu1 %v357_v4  ;;  %v325_v3 = vld [vmem:[%s220_s26 + $0x10] sm:$0xff] }
  0x1d   : > { %557 = vmatpush.msra.mxu3 %v352_v18  ;;  %542 = vmatpush.msra.mxu2 %v335_v19 }
  0x1e   : > { %361 = vmatpush.msrb.mxu0 %v340_v5  ;;  %390 = vmatpush.msrb.mxu1 %v356_v6 }
  0x1f   : > { %558 = vmatpush.msra.mxu3 %v351_v20  ;;  %543 = vmatpush.msra.mxu2 %v334_v22 }
  0x20   : > { %362 = vmatpush.msrb.mxu0 %v339_v10  ;;  %391 = vmatpush.msrb.mxu1 %v355_v11 }
  0x21   : > { %523 = vmatmul.msk.f32.gmra.mxu0 %vm239_vm1, %v231_v14  ;;  %528 = vmatmul.msk.f32.gmra.mxu1 %vm239_vm1, %v231_v14 }
  0x22   : > { %363 = vmatpush.msrb.mxu0 %v338_v12  ;;  %392 = vmatpush.msrb.mxu1 %v354_v13 }
  0x23   : > { %559 = vmatpush.msra.mxu3 %v350_v23  ;;  %544 = vmatpush.msra.mxu2 %v333_v24 }
  0x24   : > { %364 = vmatpush.msrb.mxu0 %v337_v15  ;;  %393 = vmatpush.msrb.mxu1 %v353_v16 }
  0x25   : > { %560 = vmatpush.msra.mxu3 %v349_v25  ;;  %545 = vmatpush.msra.mxu2 %v332_v26 }
  0x26   : > { %365 = vmatpush.msrb.mxu0 %v336_v17  ;;  %394 = vmatpush.msrb.mxu1 %v352_v18 }
  0x27   : > { %561 = vmatpush.msra.mxu3 %v348_v27  ;;  %546 = vmatpush.msra.mxu2 %v331_v28 }
  0x28   : > { %366 = vmatpush.msrb.mxu0 %v335_v19  ;;  %395 = vmatpush.msrb.mxu1 %v351_v20 }
  0x29   : > { %524 = vmatmul.msk.f32.gmra.mxu0 %vm239_vm1, %v232_v21  ;;  %529 = vmatmul.msk.f32.gmra.mxu1 %vm239_vm1, %v232_v21 }
  0x2a   : > { %367 = vmatpush.msrb.mxu0 %v334_v22  ;;  %396 = vmatpush.msrb.mxu1 %v350_v23 }
  0x2b   : > { %562 = vmatpush.msra.mxu3 %v347_v29  ;;  %547 = vmatpush.msra.mxu2 %v330_v31 }
  0x2c   : > { %368 = vmatpush.msrb.mxu0 %v333_v24  ;;  %397 = vmatpush.msrb.mxu1 %v349_v25 }
  0x2d   : > { %563 = vmatpush.msra.mxu3 %v346_v32  ;;  %548 = vmatpush.msra.mxu2 %v329_v33 }
  0x2e   : > { %369 = vmatpush.msrb.mxu0 %v332_v26  ;;  %398 = vmatpush.msrb.mxu1 %v348_v27 }
  0x2f   : > { %564 = vmatpush.msra.mxu3 %v345_v34  ;;  %549 = vmatpush.msra.mxu2 %v328_v35 }
  0x30   : > { %370 = vmatpush.msrb.mxu0 %v331_v28  ;;  %399 = vmatpush.msrb.mxu1 %v347_v29 }
  0x31   : > { %525 = vmatmul.msk.f32.gmra.mxu0 %vm239_vm1, %v233_v30  ;;  %530 = vmatmul.msk.f32.gmra.mxu1 %vm239_vm1, %v233_v30 }
  0x32   : > { %371 = vmatpush.msrb.mxu0 %v330_v31  ;;  %400 = vmatpush.msrb.mxu1 %v346_v32 }
  0x33   : > { %565 = vmatpush.msra.mxu3 %v344_v36  ;;  %550 = vmatpush.msra.mxu2 %v327_v37 }
  0x34   : > { %372 = vmatpush.msrb.mxu0 %v329_v33  ;;  %401 = vmatpush.msrb.mxu1 %v345_v34 }
  0x35   : > { %566 = vmatpush.msra.mxu3 %v343_v38 }
  0x36   : > { %373 = vmatpush.msrb.mxu0 %v328_v35  ;;  %402 = vmatpush.msrb.mxu1 %v344_v36 }
  0x38   : > { %374 = vmatpush.msrb.mxu0 %v327_v37  ;;  %403 = vmatpush.msrb.mxu1 %v343_v38 }
  0x96   : > { %v274_v39 = vpop.f32.mrf.mxu0  ;;  %v303_v40 = vpop.f32.mrf.mxu1 }
  0x97   : > { %v315_v41 = vmax.f32 %v274_v39, 0.0  ;;  %v316_v42 = vmax.f32 %v303_v40, 0.0 }
  0x99   : > { %375 = vmatmul.f32.vlgmr.msrb.gmra.mxu0 %v315_v41  ;;  %404 = vmatmul.f32.vlgmr.msrb.gmra.mxu1 %v316_v42 }
  0x9e   : > { %v277_v43 = vpop.f32.mrf.mxu0  ;;  %v306_v44 = vpop.f32.mrf.mxu1 }
  0x9f   : > { %v317_v45 = vmax.f32 %v277_v43, 0.0  ;;  %v318_v46 = vmax.f32 %v306_v44, 0.0 }
  0xa1   : > { %378 = vmatmul.f32.vlgmr.msra.gmra.mxu2 %v317_v45  ;;  %407 = vmatmul.f32.vlgmr.msra.gmra.mxu3 %v318_v46 }
  0xa6   : > { %v280_v47 = vpop.f32.mrf.mxu0  ;;  %v309_v48 = vpop.f32.mrf.mxu1 }
  0xa7   : > { %v319_v49 = vmax.f32 %v280_v47, 0.0  ;;  %v320_v50 = vmax.f32 %v309_v48, 0.0 }
  0xa9   : > { %381 = vmatmul.f32.gmra.mxu2 %v319_v49  ;;  %410 = vmatmul.f32.gmra.mxu3 %v320_v50 }
  0xae   : > { %v283_v51 = vpop.f32.mrf.mxu0  ;;  %v312_v52 = vpop.f32.mrf.mxu1 }
  0xaf   : > { %v321_v53 = vmax.f32 %v283_v51, 0.0  ;;  %v322_v54 = vmax.f32 %v312_v52, 0.0 }
  0xb1   : > { %384 = vmatmul.f32.gmra.mxu2 %v321_v53  ;;  %413 = vmatmul.f32.gmra.mxu3 %v322_v54 }
 0x116   : > { %v376_v56 = vpop.f32.mrf.mxu0  ;;  %v405_v58 = vpop.f32.mrf.mxu1 }
 0x117   : > { %v406_v59 = vadd.f32 %v405_v58, %v376_v56 }
 0x119   : > { %v417_v60 = vadd.f32 %v406_v59, %v323_v57 }
 0x11b   : > { %422 = vst.msk [vmem:[%s220_s26] sm:$0xff] %vm225_vm2, %v417_v60 }
 0x124   : > { %v379_v61 = vpop.f32.mrf.mxu2  ;;  %v408_v63 = vpop.f32.mrf.mxu3 }
 0x125   : > { %v409_v0 = vadd.f32 %v408_v63, %v379_v61 }
 0x127   : > { %v418_v1 = vadd.f32 %v409_v0, %v324_v62 }
 0x129   : > { %423 = vst.msk [vmem:[%s220_s26 + $0x8] sm:$0xff] %vm225_vm2, %v418_v1 }
 0x12c   : > { %v382_v2 = vpop.f32.mrf.mxu2  ;;  %v411_v4 = vpop.f32.mrf.mxu3 }
 0x12d   : > { %v412_v5 = vadd.f32 %v411_v4, %v382_v2 }
 0x12f   : > { %v419_v6 = vadd.f32 %v412_v5, %v325_v3 }
 0x131   : > { %424 = vst.msk [vmem:[%s220_s26 + $0x10] sm:$0xff] %vm225_vm2, %v419_v6 }
 0x134   : > { %v385_v7 = vpop.f32.mrf.mxu2  ;;  %v414_v9 = vpop.f32.mrf.mxu3 }
 0x135   : > { %v415_v10 = vadd.f32 %v414_v9, %v385_v7 }
 0x137   : > { %v420_v11 = vadd.f32 %v415_v10, %v326_v8 }
 0x139   : > { %425 = vst.msk [vmem:[%s220_s26 + $0x18] sm:$0xff] %vm225_vm2, %v420_v11 }
 0x13a PF: > { %s13_s14 = sadd.s32 1, %s614_s14   ;;  %s802_s12 = smov %s610_s13 }
 0x13b   : > { %p10_p5 = scmp.ge.s32.totalorder %s13_s14, 4   ;;  %s803_s13 = smov %s805_s15 }
 0x13d   :  { %12 = sbr.rel (!%p10_p5) target bundleno = 2 (0x2), region = 69 }

</bundles_post_ra>
